<compile_context>
chip_gen: v7x
topology: tpu7x:2x2x1
jax: 0.10.0
libtpu: 0.0.40
codegen_flags: <defaults>
</compile_context>

<pallas_src>
import jax
import jax.numpy as jnp
from jax.experimental import pallas as pl
from jax.experimental.pallas import tpu as pltpu


def _embed_mul_kernel(label_ref, latent_ref, table_row_ref, out_ref):
    # label_ref:     (B,)      int32  SMEM (scalar prefetch; used only by index_maps)
    # latent_ref:    (1, 1, D) f32    VMEM -- row i of latent
    # table_row_ref: (1, 1, D) f32    VMEM -- row label[i] of the embedding table
    # out_ref:       (1, 1, D) f32    VMEM
    del label_ref
    out_ref[...] = latent_ref[...] * table_row_ref[...]


def embedding_module_forward(latent, label, table):
    """latent: (B, D) f32, label: (B,) int, table: (num_class, D) f32 -> (B, D)."""
    b, d = latent.shape
    num_class = table.shape[0]

    labels = label.astype(jnp.int32).reshape(b)     # scalar-prefetch operand (SMEM)
    latent3 = latent.reshape(b, 1, d)               # last two dims == block last two dims
    table3 = table.reshape(num_class, 1, d)

    def latent_map(i, label_ref):                   # label_ref passed positionally, unused
        return (i, 0, 0)

    def table_map(i, label_ref):
        # DMA gather: one table row per grid step, selected by the prefetched label.
        # Clamp so a bad label cannot become an out-of-bounds DMA.
        idx = jnp.minimum(jnp.maximum(label_ref[i], 0), num_class - 1)
        return (idx, 0, 0)

    grid_spec = pltpu.PrefetchScalarGridSpec(
        num_scalar_prefetch=1,
        grid=(b,),
        in_specs=[
            pl.BlockSpec((1, 1, d), latent_map),    # latent row i
            pl.BlockSpec((1, 1, d), table_map),     # table row label[i]; rest stays in HBM
        ],
        out_specs=pl.BlockSpec((1, 1, d), latent_map),
    )

    out = pl.pallas_call(
        _embed_mul_kernel,
        out_shape=jax.ShapeDtypeStruct((b, 1, d), latent.dtype),
        grid_spec=grid_spec,
        compiler_params=pltpu.CompilerParams(
            dimension_semantics=("parallel",),      # shard batch rows across TCs (v7x)
        ),
        # Flat arg indices: 0 = labels (scalar prefetch), 1 = latent3, 2 = table3.
        input_output_aliases={1: 0},                # output aliases latent (same shape/dtype)
    )(labels, latent3, table3)

    return out.reshape(b, d)


def embedding_module_reference(latent, label, table):
    emb = jnp.take(table, label.astype(jnp.int32), axis=0)  # (B, D)
    emb = emb.reshape(emb.shape[0], -1)                      # Flatten(start_dim=1)
    return latent * emb


if __name__ == "__main__":
    # Small, deterministic setup.
    num_class = 10
    latent_dim = 32
    batch = 8

    key = jax.random.PRNGKey(0)
    k_table, k_latent, k_label = jax.random.split(key, 3)

    # nn.Embedding(num_class, latent_dim) initializes its weight with N(0, 1).
    table = jax.random.normal(k_table, (num_class, latent_dim), dtype=jnp.float32)
    latent = jax.random.normal(k_latent, (batch, latent_dim), dtype=jnp.float32)
    label = jax.random.randint(k_label, (batch,), 0, num_class, dtype=jnp.int32)

    out = embedding_module_forward(latent, label, table)
    out = jax.block_until_ready(out)

    ref = embedding_module_reference(latent, label, table)
    assert out.shape == (batch, latent_dim)
    assert jnp.allclose(out, ref, atol=1e-6, rtol=1e-6), "mismatch vs reference"

    print("KERNEL_OK")
</pallas_src>

<mosaic_0001>
module attributes {stable_mosaic.version = 11 : i64} {
  func.func @_embed_mul_kernel(%arg0: i32, %arg1: memref<8xi32, #tpu.memory_space<smem>>, %arg2: memref<1x1x32xf32, #tpu.memory_space<vmem>>, %arg3: memref<1x1x32xf32, #tpu.memory_space<vmem>>, %arg4: memref<1x1x32xf32, #tpu.memory_space<vmem>>) attributes {dimension_semantics = [#tpu.dimension_semantics<parallel>], iteration_bounds = array<i64: 8>, scalar_prefetch = 1 : i64, scratch_operands = 0 : i64, tpu.core_type = #tpu.core_type<tc>, window_params = [{transform_indices = @transform_0, window_bounds = array<i64: 1, 1, 32>}, {transform_indices = @transform_1, window_bounds = array<i64: 1, 1, 32>}, {transform_indices = @transform_2, window_bounds = array<i64: 1, 1, 32>}]} {
    %c0 = arith.constant 0 : index
    %c0_0 = arith.constant 0 : index
    %c0_1 = arith.constant 0 : index
    %0 = vector.load %arg2[%c0, %c0_0, %c0_1] : memref<1x1x32xf32, #tpu.memory_space<vmem>>, vector<1x1x32xf32>
    %c0_2 = arith.constant 0 : index
    %c0_3 = arith.constant 0 : index
    %c0_4 = arith.constant 0 : index
    %1 = vector.load %arg3[%c0_2, %c0_3, %c0_4] : memref<1x1x32xf32, #tpu.memory_space<vmem>>, vector<1x1x32xf32>
    %2 = arith.mulf %0, %1 : vector<1x1x32xf32>
    %c0_5 = arith.constant 0 : index
    %c0_6 = arith.constant 0 : index
    %c0_7 = arith.constant 0 : index
    %3 = vector.load %arg4[%c0_5, %c0_6, %c0_7] : memref<1x1x32xf32, #tpu.memory_space<vmem>>, vector<1x1x32xf32>
    tpu.vector_store %arg4[%c0_5, %c0_6, %c0_7], %2 {strides = array<i32>} : memref<1x1x32xf32, #tpu.memory_space<vmem>>, vector<1x1x32xf32>,
    return
  }
  func.func @transform_0(%arg0: i32, %arg1: memref<8xi32, #tpu.memory_space<smem>>) -> (i32, i32, i32) {
    %c0_i32 = arith.constant 0 : i32
    %c0_i32_0 = arith.constant 0 : i32
    %c0_i32_1 = arith.constant 0 : i32
    return %arg0, %c0_i32, %c0_i32_0 : i32, i32, i32
  }
  func.func @transform_1(%arg0: i32, %arg1: memref<8xi32, #tpu.memory_space<smem>>) -> (i32, i32, i32) {
    %0 = arith.index_cast %arg0 : i32 to index
    %1 = memref.load %arg1[%0] : memref<8xi32, #tpu.memory_space<smem>>
    %c0_i32 = arith.constant 0 : i32
    %2 = arith.maxsi %1, %c0_i32 : i32
    %c9_i32 = arith.constant 9 : i32
    %3 = arith.minsi %2, %c9_i32 : i32
    %c0_i32_0 = arith.constant 0 : i32
    %c0_i32_1 = arith.constant 0 : i32
    %c0_i32_2 = arith.constant 0 : i32
    return %3, %c0_i32_0, %c0_i32_1 : i32, i32, i32
  }
  func.func @transform_2(%arg0: i32, %arg1: memref<8xi32, #tpu.memory_space<smem>>) -> (i32, i32, i32) {
    %c0_i32 = arith.constant 0 : i32
    %c0_i32_0 = arith.constant 0 : i32
    %c0_i32_1 = arith.constant 0 : i32
    return %arg0, %c0_i32, %c0_i32_0 : i32, i32, i32
  }
}

</mosaic_0001>

<bundles_post_ra>
// kernel: tpu_custom_call.1
= control target key start
LH: loop header
LB: loop body
LE: loop exit
PB: predicated region body
PF: predicated region fallthrough
CT: control target
= control target key end

     0   :  { %s679_s0 = inlined_call_operand.vmem [shape: s32[8], index: 0, kind: input, shape index: {}]   ;;  %s680_s1 = inlined_call_operand.hbm [shape: f32[8,1,32], index: 1, kind: input, shape index: {}, may-alias: {1,3}]   ;;  %s681_s2 = inlined_call_operand.vmem [shape: f32[10,1,32], index: 2, kind: input, shape index: {}]   ;;  %s682_s3 = inlined_call_operand.hbm [shape: f32[8,1,32], index: 3, kind: output, shape index: {}, may-alias: {1,3}]  }
   0x1   :  { %s8_s14 = sshll.u32 %s679_s0, 4  ;;  %s9_s14 = int_to_ptr.vmem [resolvable:$true] %s8_s14 }
   0x2   :  { %s377_s15 = scalar_lea.vmem %s9_s14, 16  ;;  %p382_p1 = scmp.lt.s32.totalorder %s9_s14, %s9_s14 }
   0x3   :  { %p378_p0 = scmp.ne.s32.totalorder %s9_s14, %s377_s15  ;;  %p383_p2 = scmp.lt.s32.totalorder %s377_s15, %s377_s15 }
   0x5   :  { %p384_p3 = por %p383_p2, %p382_p1 }
   0x7   :  { %p385_p4 = pnand %p384_p3, %p378_p0 }
   0x9   :  { %388 = shalt.err (!%p385_p4)  }
   0xa   :  { %s489_s16 = smov [#allocation3]  }
   0xb   :  { %11 = dma.vmem_to_smem %s9_s14, 16, %s489_s16, [#allocation2] }
   0xc   :  { %463 = dma.done.wait [#allocation2], 16 }
   0xd   :  { %464 = vsyncadd [#allocation2], 4294967280 }
   0xe   :  { %13 = sfence }
   0xf   :  { %14 = vsyncpa [#allocation5], 0 }
  0x10   :  { %16 = vsyncpa [#allocation5 + $0x1], 0 }
  0x11   :  { %17 = vsyncpa [#allocation6], 0 }
  0x12   :  { %19 = vsyncpa [#allocation6 + $0x1], 0  ;;  %s515_s17 = smov 0   ;;  %s517_s0 = smov 0  }
  0x13   :  { %s519_s18 = smov 0   ;;  %s521_s19 = smov 0  }
  0x14 LB: > { %s536_s20 = sadd.s32 4294967295, %s487_s19   ;;  %s301_s21 = sadd.s32 4294967294, %s487_s19   ;;  %s487_s19 = sphi %s521_s19, %s696_s19   ;;  %s483_s18 = sphi %s519_s18, %s695_s18   ;;  %s479_s0 = sphi %s517_s0, %s694_s0   ;;  %s475_s17 = sphi %s515_s17, %s693_s17  }
  0x15   : > { %s540_s22 = sadd.s32 1, %s487_s19   ;;  %s32_s23 = sadd.s32 1, %s483_s18 }
  0x16   : > { %s29_s24 = ssub.s32 %s487_s19, %s540_s22  ;;  %p39_p5 = scmp.ne.s32.totalorder %s483_s18, %s479_s0 }
  0x17   : > { %p30_p6 = scmp.eq.s32.totalorder %s29_s24, 0  ;;  %p40_p7 = scmp.eq.s32.totalorder %s487_s19, 0 }
  0x18   : > { %p45_p8 = scmp.ne.s32.totalorder %s479_s0, %s475_s17  ;;  %p46_p9 = scmp.eq.s32.totalorder %s536_s20, 0 }
  0x19   : > { %s552_s25 = scalar_select %p30_p6, %s483_s18, %s32_s23  }
  0x1a   : > { %p554_p10 = por %p40_p7, %p39_p5  ;;  %p558_p11 = por %p46_p9, %p45_p8 }
  0x1b   : > { %p105_p12 = scmp.eq.s32.totalorder %s536_s20, 7  ;;  %p111_p13 = scmp.eq.s32.totalorder %s301_s21, 7 }
  0x1c   : > { %p342_p0 = scmp.lt.s32.totalorder %s487_s19, 8  ;;  %s131_s30 = sand.u32 1, %s483_s18  }
  0x1d   : > { %p564_p1 = por %p105_p12, %p39_p5  ;;  %p568_p2 = por %p111_p13, %p45_p8 }
  0x1e   : > { %s314_s4 = sshll.u32 %s487_s19, 4  ;;  %s134_s8 = scalar_lea.vmem [#allocation4], %s131_s30 }
  0x1f   : > { %s686_s28 = scalar_select %p564_p1, 1, 0 }
  0x20   : > { %s687_s29 = scalar_select %p568_p2, 1, 0 }
  0x21   : > { %s577_s7 = scalar_lea.hbm %s680_s1, %s314_s4  ;;  %s141_s9 = sshll.u32 %s134_s8, 4  ;;  %s579_s9 = int_to_ptr.vmem [resolvable:$true] %s141_s9 }
  0x22   : > { %p583_p3 = pnand %p342_p0, %p554_p10  ;;  %s132_s11 = scalar_lea.sflag [#allocation5], %s131_s30 }
  0x23   : > { %s389_s12 = scalar_lea.hbm %s577_s7, 16  ;;  %s394_s15 = scalar_lea.hbm %s680_s1, 128 }
  0x24   : > { %p390_p6 = scmp.ne.s32.totalorder %s577_s7, %s389_s12  ;;  %p391_p7 = pneg %p583_p3 }
  0x25   : > { %p395_p10 = scmp.lt.u32.totalorder %s577_s7, %s680_s1  ;;  %p396_p12 = scmp.lt.u32.totalorder %s394_s15, %s389_s12 }
  0x26   : > { %p392_p8 = pnand %p391_p7, %p390_p6  ;;  %p398_p0 = scmp.lt.u32.totalorder %s389_s12, %s577_s7 }
  0x27   : > { %p397_p13 = por %p396_p12, %p395_p10 }
  0x28   : > { %p393_p9 = pneg %p392_p8 }
  0x29   : > { %p399_p4 = por %p398_p0, %p397_p13 }
  0x2b   : > { %p400_p5 = pnand %p399_p4, %p393_p9 }
  0x2d   : > { %403 = shalt.err (!%p400_p5)
}
  0x2e   : > { %s404_s23 = scalar_lea.vmem %s579_s9, 16  ;;  %s490_s24 = smov [#allocation4]  }
  0x2f   : > { %p405_p6 = scmp.ne.s32.totalorder %s579_s9, %s404_s23  ;;  %s409_s26 = sshll.u32 %s490_s24, 4  ;;  %s410_s26 = int_to_ptr.vmem [resolvable:$false] %s409_s26 }
  0x30   : > { %s411_s30 = scalar_lea.vmem %s410_s26, 32  ;;  %p412_p1 = scmp.lt.s32.totalorder %s579_s9, %s410_s26 }
  0x31   : > { %p407_p8 = pnand %p405_p6, %p391_p7  ;;  %p413_p10 = scmp.lt.s32.totalorder %s411_s30, %s404_s23 }
  0x33   : > { %p408_p2 = pneg %p407_p8  ;;  %p414_p12 = por %p413_p10, %p412_p1 }
  0x35   : > { %p415_p13 = pnand %p414_p12, %p408_p2 }
  0x37   : > { %418 = shalt.err (!%p415_p13)
}
  0x38   : > { %337 = dma.hbm_to_vmem [thread:$0]  (!%p583_p3), %s577_s7, 16, %s579_s9, %s132_s11  }
  0x39   : > { %p689_p4 = scmp.lt.s32.totalorder %s487_s19, 9  ;;  %p690_p5 = scmp.ge.s32.totalorder %s487_s19, 1 }
  0x3b   : > { %p163_p7 = pnand %p690_p5, %p689_p4 }
  0x3c   : > { %s619_s4 = sand.u32 (!%p163_p7), 1, %s479_s0  }
  0x3d   : > { %166 = sbr.rel (%p163_p7) target bundleno = 100 (0x64), region = 28  ;;  %s169_s5 = scalar_lea.sflag (!%p163_p7), [#allocation5], %s619_s4 }
  0x3e   : > { %s171_s6 = scalar_lea.vmem (!%p163_p7), [#allocation4], %s619_s4 }
  0x44   : > { %466 = dma.done.wait (%p558_p11), %s169_s5, 16  }
  0x45   : > { %468 = vsyncadd (%p558_p11), %s169_s5, 4294967280  ;;  %s198_s7 = sld [smem:[#allocation3 + %s536_s20]]  ;;  %v211_v0 = vld [vmem:[%s171_s6] sm:$0x1]  ;;  %s197_s8 = scalar_lea.vmem [#allocation7], %s619_s4  ;;  %vm214_vm0 = vcmask 253952  }
  0x46   : > { %s229_s9 = sshll.u32 %s197_s8, 4  ;;  %s321_s10 = sshll.u32 %s536_s20, 4  ;;  %s633_s9 = int_to_ptr.vmem [resolvable:$true] %s229_s9 }
  0x47   : > { %s638_s15 = scalar_lea.hbm %s682_s3, %s321_s10  ;;  %s217_s16 = scalar_lea.sflag [#allocation6], %s619_s4 }
  0x48   : > { %s419_s20 = scalar_lea.vmem %s633_s9, 16  ;;  %p691_p9 = scmp.ne.s32.totalorder %s686_s28, 0 }
  0x49   : > { %p420_p11 = scmp.ne.s32.totalorder %s633_s9, %s419_s20  ;;  %s491_s21 = smov [#allocation7]  }
  0x4a   : > { %s423_s23 = sshll.u32 %s491_s21, 4  ;;  %s424_s23 = int_to_ptr.vmem [resolvable:$false] %s423_s23 }
  0x4b   : > { %p199_p1 = scmp.gt.s32.totalorder %s198_s7, 0  ;;  %p316_p2 = scmp.lt.s32.totalorder %s198_s7, 9 }
  0x4c   : > { %p421_p0 = pnand %p420_p11, %p691_p9  ;;  %s425_s24 = scalar_lea.vmem %s424_s23, 32 }
  0x4d   : > { %s698_s7 = smov (!%p199_p1, %s198_s7), 0  ;;  %p426_p8 = scmp.lt.s32.totalorder %s633_s9, %s424_s23 }
  0x4e   : > { %s700_s7 = smov (!%p316_p2, %s698_s7), 9  ;;  %p422_p6 = pneg %p421_p0 }
  0x4f   : > { %p203_p3 = scmp.lt.s32.totalorder %s700_s7, 9  ;;  %p427_p10 = scmp.lt.s32.totalorder %s425_s24, %s419_s20 }
  0x51   : > { %s702_s7 = smov (!%p203_p3, %s700_s7), 9  ;;  %p428_p12 = por %p427_p10, %p426_p8 }
  0x52   : > { %s205_s27 = scalar_lea.vmem %s681_s2, %s702_s7 }
  0x53   : > { %v212_v1 = vld [vmem:[%s205_s27] sm:$0x1]  ;;  %p429_p13 = pnand %p428_p12, %p422_p6 }
  0x54   : > { %v213_v2 = vmul.f32 %v212_v1, %v211_v0 }
  0x56   : > { %215 = vst.msk [vmem:[%s197_s8] sm:$0x1] %vm214_vm0, %v213_v2 }
  0x57   : > { %432 = shalt.err (!%p429_p13)
}
  0x58   : > { %s433_s26 = scalar_lea.hbm %s638_s15, 16  ;;  %s437_s5 = scalar_lea.hbm %s682_s3, 128 }
  0x59   : > { %p434_p4 = scmp.ne.s32.totalorder %s638_s15, %s433_s26  ;;  %p438_p1 = scmp.lt.u32.totalorder %s638_s15, %s682_s3 }
  0x5a   : > { %p439_p2 = scmp.lt.u32.totalorder %s437_s5, %s433_s26  ;;  %p441_p11 = scmp.lt.u32.totalorder %s433_s26, %s638_s15 }
  0x5b   : > { %p435_p5 = pnand %p434_p4, %p691_p9 }
  0x5c   : > { %p440_p3 = por %p439_p2, %p438_p1 }
  0x5d   : > { %p436_p7 = pneg %p435_p5 }
  0x5e   : > { %p442_p0 = por %p441_p11, %p440_p3 }
  0x60   : > { %p443_p6 = pnand %p442_p0, %p436_p7 }
  0x62   : > { %446 = shalt.err (!%p443_p6)
}
  0x63   : > { %332 = dma.vmem_to_hbm [thread:$0]  (%p691_p9), %s633_s9, 16, %s638_s15, %s217_s16  }
  0x64 PF: > { %p343_p8 = scmp.ge.s32.totalorder %s487_s19, 2  ;;  %s241_s8 = sand.u32 1, %s475_s17  }
  0x65   : > { %p692_p10 = scmp.ne.s32.totalorder %s687_s29, 0  ;;  %s242_s10 = scalar_lea.sflag [#allocation6], %s241_s8 }
  0x67   : > { %p339_p12 = pnand %p343_p8, %p692_p10 }
  0x69   : > { %470 = dma.done.wait (!%p339_p12), %s242_s10, 16  }
  0x6a   : > { %472 = vsyncadd (!%p339_p12), %s242_s10, 4294967280  ;;  %p22_p13 = scmp.ge.s32.totalorder %s540_s22, 10   ;;  %s693_s17 = smov %s479_s0 }
  0x6b   : > { %s694_s0 = smov %s483_s18  ;;  %s695_s18 = smov %s552_s25 }
  0x6c   : > { %s696_s19 = smov %s540_s22  ;;  %24 = sbr.rel (!%p22_p13) target bundleno = 20 (0x14), region = 76 }
  0x73   :  { %246 = vsyncpa [#allocation5], 1 }
  0x74   :  { %248 = vsyncpa [#allocation5 + $0x1], 1 }
  0x75   :  { %249 = vsyncpa [#allocation6], 1 }
  0x76   :  { %251 = vsyncpa [#allocation6 + $0x1], 1 }

</bundles_post_ra>
